<compile_context>
chip_gen: v7x
topology: tpu7x:2x2x1
jax: 0.10.0
libtpu: 0.0.40
codegen_flags: <defaults>
</compile_context>

<pallas_src>
import jax
import jax.numpy as jnp
from jax import lax
from jax.experimental import pallas as pl
from jax.experimental.pallas import tpu as pltpu


# ----------------------------------------------------------------------------- kernel
def final_fc_kernel(x_ref, w_ref, b_ref, o_ref):
    x = x_ref[...]                                           # (TN, D) f32

    # Row-wise squared L2 norm in f32 (XLU reduce), rsqrt on EUP.
    sq = jnp.sum(x * x, axis=1, keepdims=True)               # (TN, 1)
    inv = lax.rsqrt(jnp.maximum(sq, 1e-24))                  # == 1/max(||x||, 1e-12)

    # MXU matmul: bf16 inputs, f32 accumulation.  W is pre-transposed,
    # pre-padded, pre-cast (D, C_pad) bf16, so this is a plain contraction
    # with a lane-dense output -- no in-kernel transpose or weight cast.
    y = jnp.dot(
        x.astype(jnp.bfloat16),
        w_ref[...],
        preferred_element_type=jnp.float32,
    )                                                        # (TN, C_pad)

    # Scale-after-matmul (per-row scalar) + bias, lane-dense store.
    o_ref[...] = (y * inv + b_ref[...]).astype(o_ref.dtype)


# ----------------------------------------------------------------------------- helpers
def _round_up(v, m):
    return ((v + m - 1) // m) * m


def _vmem_capacity_bytes():
    """Physical VMEM per core; conservative (v7x) fallback if the query fails."""
    try:
        info = pltpu.get_tpu_info()
        for attr in ("vmem_capacity_bytes", "vmem_size_bytes", "vmem_bytes"):
            v = getattr(info, attr, None)
            if v:
                return int(v)
    except Exception:
        pass
    return 64 * 1024 * 1024


def _pick_tn(n, d, c_pad, budget_bytes, tn_max):
    """Largest row tile (multiple of 16) fitting the VMEM budget.

    Budget model: 2x double-buffered x tile (f32) + single resident bf16 W +
    bias + 2x double-buffered f32 output tile.
    """
    def fits(t):
        need = (2 * t * d * 4          # x tile, double-buffered, f32
                + d * c_pad * 2        # resident W, bf16, single buffer
                + c_pad * 4            # resident bias, f32
                + 2 * t * c_pad * 4)   # output tile, double-buffered, f32
        return need <= budget_bytes

    tn = min(tn_max, max(16, _round_up(n, 16)))
    while tn > 16 and not fits(tn):
        tn = max(16, _round_up(tn // 2, 16))
    return tn


# ----------------------------------------------------------------------------- wrapper
def prepare_params(weight, bias):
    """One-time parameter prep (do this at model init, not per forward).

    weight: (C, D) PyTorch layout, f32.  Returns:
      w_p: (D, C_pad) bf16   -- padded lane-dense, transposed, pre-cast
      b_p: (1, C_pad) f32
    """
    c, d = weight.shape
    c_pad = _round_up(c, 256) if c > 128 else 128            # 256-wide MXU on v6e/v7x
    w_p = jnp.pad(weight, ((0, c_pad - c), (0, 0))).T.astype(jnp.bfloat16)
    b_p = jnp.pad(bias, (0, c_pad - c)).reshape(1, c_pad).astype(jnp.float32)
    return w_p, b_p


def final_fc(x, w_p, b_p, num_class):
    """x: (N, D) f32; w_p/b_p from prepare_params(); returns (N, num_class) f32."""
    n, d = x.shape
    d_w, c_pad = w_p.shape
    assert d_w == d, (d_w, d)

    # Generation-aware VMEM sizing (v5e/v6e: 128 MiB, v7x: 64 MiB per core).
    cap = _vmem_capacity_bytes()
    budget = int(cap * 0.70)
    tn_max = 1024 if cap >= 96 * 1024 * 1024 else 512
    vmem_limit = min(int(cap * 0.85), 100 * 1024 * 1024)

    tn = _pick_tn(n, d, c_pad, budget, tn_max)
    n_pad = _round_up(n, tn)
    x_p = jnp.pad(x, ((0, n_pad - n), (0, 0))) if n_pad != n else x

    def build(single_buffer_invariants):
        # Loop-invariant W/bias: single-buffered when supported (frees one full
        # copy of W worth of VMEM for a bigger row tile).
        inv_kwargs = (
            dict(pipeline_mode=pl.Buffered(1)) if single_buffer_invariants else {}
        )
        return pl.pallas_call(
            final_fc_kernel,
            out_shape=jax.ShapeDtypeStruct((n_pad, c_pad), jnp.float32),
            grid_spec=pltpu.PrefetchScalarGridSpec(
                num_scalar_prefetch=0,
                grid=(n_pad // tn,),
                in_specs=[
                    pl.BlockSpec((tn, d), lambda i: (i, 0)),                 # x tile
                    pl.BlockSpec((d, c_pad), lambda i: (0, 0), **inv_kwargs),  # W resident
                    pl.BlockSpec((1, c_pad), lambda i: (0, 0), **inv_kwargs),  # bias resident
                ],
                out_specs=pl.BlockSpec((tn, c_pad), lambda i: (i, 0)),
            ),
            compiler_params=pltpu.CompilerParams(
                dimension_semantics=("parallel",),
                vmem_limit_bytes=vmem_limit,
            ),
        )

    try:
        out = build(True)(x_p, w_p, b_p)
    except Exception:
        # pipeline_mode not supported by this JAX/Mosaic build -> default buffering.
        out = build(False)(x_p, w_p, b_p)

    # Callers that can consume the padded (N_pad, C_pad) slab should skip this slice.
    return out[:n, :num_class]


# ----------------------------------------------------------------------------- demo / check
if __name__ == "__main__":
    # Small shapes consistent with the module: Final_FC(input_dim, gost, num_class),
    # fc input features = input_dim * gost * 1.
    input_dim, gost, num_class = 32, 4, 120
    batch = 8
    d = input_dim * gost  # 128

    key = jax.random.PRNGKey(0)
    kx, kw = jax.random.split(key)

    x = jax.random.normal(kx, (batch, d), dtype=jnp.float32)

    # Deterministic parameter init matching the module's __init__:
    #   weight ~ N(0, 0.01), bias = 0
    weight = 0.01 * jax.random.normal(kw, (num_class, d), dtype=jnp.float32)
    bias = jnp.zeros((num_class,), dtype=jnp.float32)

    # One-time parameter prep (hoisted out of the per-call path).
    w_p, b_p = prepare_params(weight, bias)

    out = final_fc(x, w_p, b_p, num_class)
    out = jax.block_until_ready(out)

    # Reference check in plain f32 JAX (same math as the PyTorch forward).
    xn = x / jnp.maximum(jnp.linalg.norm(x, axis=1, keepdims=True), 1e-12)
    ref = xn @ weight.T + bias
    assert out.shape == (batch, num_class)
    # Tolerance loosened for bf16 MXU inputs (f32 accumulation).
    assert jnp.allclose(out, ref, atol=2e-3, rtol=1e-2), float(
        jnp.max(jnp.abs(out - ref))
    )

    print("KERNEL_OK")
</pallas_src>

<mosaic_0001>
module attributes {stable_mosaic.version = 11 : i64} {
  func.func @final_fc_kernel(%arg0: i32, %arg1: memref<16x128xf32, #tpu.memory_space<vmem>>, %arg2: memref<128x128xbf16, #tpu.memory_space<vmem>>, %arg3: memref<1x128xf32, #tpu.memory_space<vmem>>, %arg4: memref<16x128xf32, #tpu.memory_space<vmem>>) attributes {dimension_semantics = [#tpu.dimension_semantics<parallel>], iteration_bounds = array<i64: 1>, scalar_prefetch = 0 : i64, scratch_operands = 0 : i64, tpu.core_type = #tpu.core_type<tc>, window_params = [{transform_indices = @transform_0, window_bounds = array<i64: 16, 128>}, {pipeline_mode = #tpu.pipeline_mode<synchronous>, transform_indices = @transform_1, window_bounds = array<i64: 128, 128>}, {pipeline_mode = #tpu.pipeline_mode<synchronous>, transform_indices = @transform_2, window_bounds = array<i64: 1, 128>}, {transform_indices = @transform_3, window_bounds = array<i64: 16, 128>}]} {
    %c0 = arith.constant 0 : index
    %c0_0 = arith.constant 0 : index
    %0 = vector.load %arg1[%c0, %c0_0] : memref<16x128xf32, #tpu.memory_space<vmem>>, vector<16x128xf32>
    %1 = arith.mulf %0, %0 : vector<16x128xf32>
    %cst = arith.constant dense<0.000000e+00> : vector<16xf32>
    %2 = vector.multi_reduction <add>, %1, %cst [1] : vector<16x128xf32> to vector<16xf32>
    %3 = vector.shape_cast %2 : vector<16xf32> to vector<16x1xf32>
    %cst_1 = arith.constant 1.000000e-24 : f32
    %4 = vector.broadcast %cst_1 : f32 to vector<16x1xf32>
    %5 = arith.maximumf %3, %4 : vector<16x1xf32>
    %6 = math.rsqrt %5 : vector<16x1xf32>
    %7 = arith.truncf %0 : vector<16x128xf32> to vector<16x128xbf16>
    %c0_2 = arith.constant 0 : index
    %c0_3 = arith.constant 0 : index
    %8 = vector.load %arg2[%c0_2, %c0_3] : memref<128x128xbf16, #tpu.memory_space<vmem>>, vector<128x128xbf16>
    %cst_4 = arith.constant dense<0.000000e+00> : vector<16x128xf32>
    %9 = tpu.matmul %7, %8, %cst_4 {dimension_numbers = #tpu.dot_dimension_numbers<[1], [0], [0], [1], [0, 0, 1, 1], [], []>} : vector<16x128xbf16>, vector<128x128xbf16>, vector<16x128xf32> -> vector<16x128xf32>
    %10 = vector.broadcast %6 : vector<16x1xf32> to vector<16x128xf32>
    %11 = arith.mulf %9, %10 : vector<16x128xf32>
    %c0_5 = arith.constant 0 : index
    %c0_6 = arith.constant 0 : index
    %12 = vector.load %arg3[%c0_5, %c0_6] : memref<1x128xf32, #tpu.memory_space<vmem>>, vector<1x128xf32>
    %13 = vector.broadcast %12 : vector<1x128xf32> to vector<16x128xf32>
    %14 = arith.addf %11, %13 : vector<16x128xf32>
    %c0_7 = arith.constant 0 : index
    %c0_8 = arith.constant 0 : index
    %15 = vector.load %arg4[%c0_7, %c0_8] : memref<16x128xf32, #tpu.memory_space<vmem>>, vector<16x128xf32>
    tpu.vector_store %arg4[%c0_7, %c0_8], %14 {strides = array<i32>} : memref<16x128xf32, #tpu.memory_space<vmem>>, vector<16x128xf32>,
    return
  }
  func.func @transform_0(%arg0: i32) -> (i32, i32) {
    %c0_i32 = arith.constant 0 : i32
    %c0_i32_0 = arith.constant 0 : i32
    return %arg0, %c0_i32 : i32, i32
  }
  func.func @transform_1(%arg0: i32) -> (i32, i32) {
    %c0_i32 = arith.constant 0 : i32
    %c0_i32_0 = arith.constant 0 : i32
    %c0_i32_1 = arith.constant 0 : i32
    return %c0_i32, %c0_i32_0 : i32, i32
  }
  func.func @transform_2(%arg0: i32) -> (i32, i32) {
    %c0_i32 = arith.constant 0 : i32
    %c0_i32_0 = arith.constant 0 : i32
    %c0_i32_1 = arith.constant 0 : i32
    return %c0_i32, %c0_i32_0 : i32, i32
  }
  func.func @transform_3(%arg0: i32) -> (i32, i32) {
    %c0_i32 = arith.constant 0 : i32
    %c0_i32_0 = arith.constant 0 : i32
    return %arg0, %c0_i32 : i32, i32
  }
}

module attributes {stable_mosaic.version = 11 : i64} {
  func.func @final_fc_kernel(%arg0: i32, %arg1: memref<16x128xf32, #tpu.memory_space<vmem>>, %arg2: memref<128x128xbf16, #tpu.memory_space<vmem>>, %arg3: memref<1x128xf32, #tpu.memory_space<vmem>>, %arg4: memref<16x128xf32, #tpu.memory_space<vmem>>) attributes {dimension_semantics = [#tpu.dimension_semantics<parallel>], iteration_bounds = array<i64: 1>, scalar_prefetch = 0 : i64, scratch_operands = 0 : i64, tpu.core_type = #tpu.core_type<tc>, window_params = [{transform_indices = @transform_0, window_bounds = array<i64: 16, 128>}, {pipeline_mode = #tpu.pipeline_mode<synchronous>, transform_indices = @transform_1, window_bounds = array<i64: 128, 128>}, {pipeline_mode = #tpu.pipeline_mode<synchronous>, transform_indices = @transform_2, window_bounds = array<i64: 1, 128>}, {transform_indices = @transform_3, window_bounds = array<i64: 16, 128>}]} {
    %c0 = arith.constant 0 : index
    %c0_0 = arith.constant 0 : index
    %0 = vector.load %arg1[%c0, %c0_0] : memref<16x128xf32, #tpu.memory_space<vmem>>, vector<16x128xf32>
    %1 = arith.mulf %0, %0 : vector<16x128xf32>
    %cst = arith.constant dense<0.000000e+00> : vector<16xf32>
    %2 = vector.multi_reduction <add>, %1, %cst [1] : vector<16x128xf32> to vector<16xf32>
    %3 = vector.shape_cast %2 : vector<16xf32> to vector<16x1xf32>
    %cst_1 = arith.constant 1.000000e-24 : f32
    %4 = vector.broadcast %cst_1 : f32 to vector<16x1xf32>
    %5 = arith.maximumf %3, %4 : vector<16x1xf32>
    %6 = math.rsqrt %5 : vector<16x1xf32>
    %7 = arith.truncf %0 : vector<16x128xf32> to vector<16x128xbf16>
    %c0_2 = arith.constant 0 : index
    %c0_3 = arith.constant 0 : index
    %8 = vector.load %arg2[%c0_2, %c0_3] : memref<128x128xbf16, #tpu.memory_space<vmem>>, vector<128x128xbf16>
    %cst_4 = arith.constant dense<0.000000e+00> : vector<16x128xf32>
    %9 = tpu.matmul %7, %8, %cst_4 {dimension_numbers = #tpu.dot_dimension_numbers<[1], [0], [0], [1], [0, 0, 1, 1], [], []>} : vector<16x128xbf16>, vector<128x128xbf16>, vector<16x128xf32> -> vector<16x128xf32>
    %10 = vector.broadcast %6 : vector<16x1xf32> to vector<16x128xf32>
    %11 = arith.mulf %9, %10 : vector<16x128xf32>
    %c0_5 = arith.constant 0 : index
    %c0_6 = arith.constant 0 : index
    %12 = vector.load %arg3[%c0_5, %c0_6] : memref<1x128xf32, #tpu.memory_space<vmem>>, vector<1x128xf32>
    %13 = vector.broadcast %12 : vector<1x128xf32> to vector<16x128xf32>
    %14 = arith.addf %11, %13 : vector<16x128xf32>
    %c0_7 = arith.constant 0 : index
    %c0_8 = arith.constant 0 : index
    %15 = vector.load %arg4[%c0_7, %c0_8] : memref<16x128xf32, #tpu.memory_space<vmem>>, vector<16x128xf32>
    tpu.vector_store %arg4[%c0_7, %c0_8], %14 {strides = array<i32>} : memref<16x128xf32, #tpu.memory_space<vmem>>, vector<16x128xf32>,
    return
  }
  func.func @transform_0(%arg0: i32) -> (i32, i32) {
    %c0_i32 = arith.constant 0 : i32
    %c0_i32_0 = arith.constant 0 : i32
    return %arg0, %c0_i32 : i32, i32
  }
  func.func @transform_1(%arg0: i32) -> (i32, i32) {
    %c0_i32 = arith.constant 0 : i32
    %c0_i32_0 = arith.constant 0 : i32
    %c0_i32_1 = arith.constant 0 : i32
    return %c0_i32, %c0_i32_0 : i32, i32
  }
  func.func @transform_2(%arg0: i32) -> (i32, i32) {
    %c0_i32 = arith.constant 0 : i32
    %c0_i32_0 = arith.constant 0 : i32
    %c0_i32_1 = arith.constant 0 : i32
    return %c0_i32, %c0_i32_0 : i32, i32
  }
  func.func @transform_3(%arg0: i32) -> (i32, i32) {
    %c0_i32 = arith.constant 0 : i32
    %c0_i32_0 = arith.constant 0 : i32
    return %arg0, %c0_i32 : i32, i32
  }
}

</mosaic_0001>

<bundles_post_ra>
// kernel: tpu_custom_call.1
= control target key start
LH: loop header
LB: loop body
LE: loop exit
PB: predicated region body
PF: predicated region fallthrough
CT: control target
= control target key end

     0   :  { %8 = vsyncpa [#allocation3], 0  ;;  %s398_s0 = inlined_call_operand.hbm [shape: f32[16,128], index: 0, kind: input, shape index: {}]   ;;  %s399_s1 = inlined_call_operand.hbm [shape: bf16[128,128], index: 1, kind: input, shape index: {}]   ;;  %s400_s2 = inlined_call_operand.vmem [shape: f32[1,128], index: 2, kind: input, shape index: {}]   ;;  %s401_s3 = inlined_call_operand.hbm [shape: f32[16,128], index: 3, kind: output, shape index: {}]  }
   0x1   :  { %9 = vsyncpa [#allocation6], 0 }
   0x2   :  { %10 = vsyncpa [#allocation4], 0  ;;  %s324_s12 = smov [#allocation2]   ;;  %s252_s16 = scalar_lea.hbm %s398_s0, 256 }
   0x3   :  { %s16_s13 = sshll.u32 %s324_s12, 4  ;;  %p253_p0 = scmp.ne.s32.totalorder %s398_s0, %s252_s16  ;;  %s17_s13 = int_to_ptr.vmem [resolvable:$true] %s16_s13 }
   0x4   :  { %p256_p1 = scmp.lt.u32.totalorder %s252_s16, %s398_s0 }
   0x6   :  { %p258_p2 = pnand %p256_p1, %p253_p0 }
   0x8   :  { %261 = shalt.err (!%p258_p2)
}
   0x9   :  { %s262_s21 = scalar_lea.vmem %s17_s13, 256  ;;  %p267_p4 = scmp.lt.s32.totalorder %s17_s13, %s17_s13 }
   0xa   :  { %p263_p3 = scmp.ne.s32.totalorder %s17_s13, %s262_s21  ;;  %p268_p5 = scmp.lt.s32.totalorder %s262_s21, %s262_s21 }
   0xc   :  { %p269_p6 = por %p268_p5, %p267_p4 }
   0xe   :  { %p270_p7 = pnand %p269_p6, %p263_p3 }
  0x10   :  { %273 = shalt.err (!%p270_p7)
}
  0x11   :  { %s325_s22 = smov 128   ;;  %s326_s23 = smov 8  }
  0x12   :  { %22 = dma.hbm_to_vmem [thread:$0]  %s398_s0, 256, %s17_s13, [#allocation3], %s325_s22, %s325_s22, %s326_s23  }
  0x13   :  { %s327_s26 = smov [#allocation5]   ;;  %s274_s30 = scalar_lea.hbm %s399_s1, 1024 }
  0x14   :  { %s28_s27 = sshll.u32 %s327_s26, 4  ;;  %p275_p8 = scmp.ne.s32.totalorder %s399_s1, %s274_s30  ;;  %s29_s27 = int_to_ptr.vmem [resolvable:$true] %s28_s27 }
  0x15   :  { %p278_p9 = scmp.lt.u32.totalorder %s274_s30, %s399_s1 }
  0x17   :  { %p280_p10 = pnand %p278_p9, %p275_p8 }
  0x19   :  { %283 = shalt.err (!%p280_p10)
}
  0x1a   :  { %s284_s8 = scalar_lea.vmem %s29_s27, 1024  ;;  %p289_p12 = scmp.lt.s32.totalorder %s29_s27, %s29_s27 }
  0x1b   :  { %p285_p11 = scmp.ne.s32.totalorder %s29_s27, %s284_s8  ;;  %p290_p13 = scmp.lt.s32.totalorder %s284_s8, %s284_s8 }
  0x1d   :  { %p291_p0 = por %p290_p13, %p289_p12 }
  0x1f   :  { %p292_p1 = pnand %p291_p0, %p285_p11 }
  0x21   :  { %295 = shalt.err (!%p292_p1)
}
  0x22   :  { %s328_s0 = smov 64   ;;  %s329_s9 = smov 4  }
  0x23   :  { %34 = dma.hbm_to_vmem [thread:$0]  %s399_s1, 1024, %s29_s27, [#allocation6], %s328_s0, %s328_s0, %s329_s9  }
  0x24   :  { %318 = dma.done.wait [#allocation3], 256  }
  0x25   :  { %319 = vsyncadd [#allocation3], 4294967040 }
  0x26   :  { %320 = dma.done.wait [#allocation6], 1024  }
  0x27   :  { %321 = vsyncadd [#allocation6], 4294966272  ;;  %v330_v0 = vmov 0.0   ;;  %vm331_vm0 = vmmov 0   ;;  %v240_v1 = vld [vmem:[#allocation5] sm:$0xff]   ;;  %v241_v2 = vld [vmem:[#allocation5 + $0x8] sm:$0xff]  }
  0x28   :  { %211 = vmatprep.subr.bf16.mxu0 %v330_v0  ;;  %227 = vmatprep.mubr.msk.bf16.mxu0 %vm331_vm0, %v330_v0  ;;  %v242_v3 = vld [vmem:[#allocation5 + $0x10] sm:$0xff]   ;;  %v243_v6 = vld [vmem:[#allocation5 + $0x18] sm:$0xff]   ;;  %v244_v9 = vld [vmem:[#allocation5 + $0x20] sm:$0xff]   ;;  %s332_s13 = smov [#allocation7]  }
  0x29   :  { %212 = vmatpush3.bf16.msra.mxu0 %v240_v1  ;;  %v44_v4 = vld [vmem:[#allocation2] sm:$0xff]  ;;  %v45_v7 = vld [vmem:[#allocation2 + $0x8] sm:$0xff]  ;;  %v245_v10 = vld [vmem:[#allocation5 + $0x28] sm:$0xff]   ;;  %s180_s14 = sshll.u32 %s332_s13, 4  ;;  %s181_s14 = int_to_ptr.vmem [resolvable:$true] %s180_s14 }
  0x2a   :  { %213 = vmatprep.subr.bf16.mxu0 %v330_v0  ;;  %v46_v5 = vmul.f32 %v44_v4, %v44_v4  ;;  %v47_v8 = vmul.f32 %v45_v7, %v45_v7  ;;  %v246_v11 = vld [vmem:[#allocation5 + $0x30] sm:$0xff]   ;;  %v247_v12 = vld [vmem:[#allocation5 + $0x38] sm:$0xff]   ;;  %v56_v13 = vpack.c.bf16 %v45_v7, %v44_v4  ;;  %s296_s15 = scalar_lea.vmem %s181_s14, 256  ;;  %p301_p3 = scmp.lt.s32.totalorder %s181_s14, %s181_s14 }
  0x2b   :  { %v201_v21 = vld [vmem:[%s400_s2] ss:$0 sm:$0xff]  ;;  %p297_p2 = scmp.ne.s32.totalorder %s181_s14, %s296_s15  ;;  %p302_p4 = scmp.lt.s32.totalorder %s296_s15, %s296_s15 }
  0x2c   :  { %48 = vadd.xlane.f32.xlu0 %v46_v5 }
  0x2d   :  { %214 = vmatpush3.bf16.msra.mxu0 %v241_v2  ;;  %p303_p5 = por %p302_p4, %p301_p3 }
  0x2e   :  { %215 = vmatprep.subr.bf16.mxu0 %v330_v0 }
  0x2f   :  { %p304_p6 = pnand %p303_p5, %p297_p2 }
  0x30   :  { %50 = vadd.xlane.f32.xlu0 %v47_v8 }
  0x31   :  { %216 = vmatpush3.bf16.msra.mxu0 %v242_v3 }
  0x32   :  { %217 = vmatprep.subr.bf16.mxu0 %v330_v0 }
  0x35   :  { %218 = vmatpush3.bf16.msra.mxu0 %v243_v6 }
  0x36   :  { %219 = vmatprep.subr.bf16.mxu0 %v330_v0 }
  0x39   :  { %220 = vmatpush3.bf16.msra.mxu0 %v244_v9 }
  0x3a   :  { %221 = vmatprep.subr.bf16.mxu0 %v330_v0 }
  0x3d   :  { %222 = vmatpush3.bf16.msra.mxu0 %v245_v10 }
  0x3e   :  { %223 = vmatprep.subr.bf16.mxu0 %v330_v0 }
  0x41   :  { %224 = vmatpush3.bf16.msra.mxu0 %v246_v11 }
  0x42   :  { %225 = vmatprep.subr.bf16.mxu0 %v330_v0 }
  0x45   :  { %226 = vmatpush3.bf16.msra.mxu0 %v247_v12 }
  0x48   :  { %228 = vmatmul.mubr.bf16.vlgmr.msra.gmra.mrb[0].mxu0 %v56_v13 }
  0xb9   :  { %v49_v14 = vpop.xlane.xlu0 %48 }
  0xba   :  { %v52_v16 = vmax.f32 %v49_v14, 1e-24 }
  0xbc   :  { %248 = vrsqrt.f32 %v52_v16 }
  0xbd   :  { %v51_v15 = vpop.xlane.xlu0 %50 }
  0xbe   :  { %v53_v17 = vmax.f32 %v51_v15, 1e-24 }
  0xc0   :  { %250 = vrsqrt.f32 %v53_v17 }
  0xc6   :  { %v249_v18 = vpop.eup %248 }
  0xca   :  { %v251_v19 = vpop.eup %250 }
 0x11b   :  { %v155_v20 = vpop.f32.mrb[0].mxu0 }
 0x11c   :  { %v162_v22 = vmul.f32 %v249_v18, %v155_v20  ;;  %v229_v23 = vpop.f32.mrb[1].mxu0 }
 0x11d   :  { %v158_v24 = vpop.f32.mrb[2].mxu0 }
 0x11e   :  { %v171_v25 = vadd.f32 %v201_v21, %v162_v22  ;;  %v163_v26 = vmul.f32 %v251_v19, %v158_v24  ;;  %v230_v27 = vpop.f32.mrb[3].mxu0 }
 0x120   :  { %173 = vst [vmem:[#allocation7] sm:$0xff] %v171_v25  ;;  %v172_v28 = vadd.f32 %v201_v21, %v163_v26 }
 0x122   :  { %174 = vst [vmem:[#allocation7 + $0x8] sm:$0xff] %v172_v28 }
 0x123   :  { %307 = shalt.err (!%p304_p6)
}
 0x124   :  { %s308_s17 = scalar_lea.hbm %s401_s3, 256 }
 0x125   :  { %p309_p7 = scmp.ne.s32.totalorder %s401_s3, %s308_s17  ;;  %p312_p8 = scmp.lt.u32.totalorder %s308_s17, %s401_s3 }
 0x127   :  { %p314_p9 = pnand %p312_p8, %p309_p7 }
 0x129   :  { %317 = shalt.err (!%p314_p9)
}
 0x12a   :  { %186 = dma.vmem_to_hbm [thread:$0]  %s181_s14, 256, %s401_s3, [#allocation4], %s325_s22, %s325_s22, %s326_s23  }
 0x12b   :  { %322 = dma.done.wait [#allocation4], 256  }
 0x12c   :  { %323 = vsyncadd [#allocation4], 4294967040 }
 0x12d   :  { %190 = vsyncpa [#allocation3], 1 }
 0x12e   :  { %191 = vsyncpa [#allocation6], 1 }
 0x12f   :  { %192 = vsyncpa [#allocation4], 1 }

// kernel: tpu_custom_call.1
= control target key start
LH: loop header
LB: loop body
LE: loop exit
PB: predicated region body
PF: predicated region fallthrough
CT: control target
= control target key end

     0   :  { %8 = vsyncpa [#allocation3], 0  ;;  %s398_s0 = inlined_call_operand.hbm [shape: f32[16,128], index: 0, kind: input, shape index: {}]   ;;  %s399_s1 = inlined_call_operand.hbm [shape: bf16[128,128], index: 1, kind: input, shape index: {}]   ;;  %s400_s2 = inlined_call_operand.vmem [shape: f32[1,128], index: 2, kind: input, shape index: {}]   ;;  %s401_s3 = inlined_call_operand.hbm [shape: f32[16,128], index: 3, kind: output, shape index: {}]  }
   0x1   :  { %9 = vsyncpa [#allocation6], 0 }
   0x2   :  { %10 = vsyncpa [#allocation4], 0  ;;  %s324_s12 = smov [#allocation2]   ;;  %s252_s16 = scalar_lea.hbm %s398_s0, 256 }
   0x3   :  { %s16_s13 = sshll.u32 %s324_s12, 4  ;;  %p253_p0 = scmp.ne.s32.totalorder %s398_s0, %s252_s16  ;;  %s17_s13 = int_to_ptr.vmem [resolvable:$true] %s16_s13 }
   0x4   :  { %p256_p1 = scmp.lt.u32.totalorder %s252_s16, %s398_s0 }
   0x6   :  { %p258_p2 = pnand %p256_p1, %p253_p0 }
   0x8   :  { %261 = shalt.err (!%p258_p2)
}
   0x9   :  { %s262_s21 = scalar_lea.vmem %s17_s13, 256  ;;  %p267_p4 = scmp.lt.s32.totalorder %s17_s13, %s17_s13 }
   0xa   :  { %p263_p3 = scmp.ne.s32.totalorder %s17_s13, %s262_s21  ;;  %p268_p5 = scmp.lt.s32.totalorder %s262_s21, %s262_s21 }
   0xc   :  { %p269_p6 = por %p268_p5, %p267_p4 }
   0xe   :  { %p270_p7 = pnand %p269_p6, %p263_p3 }
  0x10   :  { %273 = shalt.err (!%p270_p7)
}
  0x11   :  { %s325_s22 = smov 128   ;;  %s326_s23 = smov 8  }
  0x12   :  { %22 = dma.hbm_to_vmem [thread:$0]  %s398_s0, 256, %s17_s13, [#allocation3], %s325_s22, %s325_s22, %s326_s23  }
  0x13   :  { %s327_s26 = smov [#allocation5]   ;;  %s274_s30 = scalar_lea.hbm %s399_s1, 1024 }
  0x14   :  { %s28_s27 = sshll.u32 %s327_s26, 4  ;;  %p275_p8 = scmp.ne.s32.totalorder %s399_s1, %s274_s30  ;;  %s29_s27 = int_to_ptr.vmem [resolvable:$true] %s28_s27 }
  0x15   :  { %p278_p9 = scmp.lt.u32.totalorder %s274_s30, %s399_s1 }
  0x17   :  { %p280_p10 = pnand %p278_p9, %p275_p8 }
  0x19   :  { %283 = shalt.err (!%p280_p10)
}
  0x1a   :  { %s284_s8 = scalar_lea.vmem %s29_s27, 1024  ;;  %p289_p12 = scmp.lt.s32.totalorder %s29_s27, %s29_s27 }
  0x1b   :  { %p285_p11 = scmp.ne.s32.totalorder %s29_s27, %s284_s8  ;;  %p290_p13 = scmp.lt.s32.totalorder %s284_s8, %s284_s8 }
  0x1d   :  { %p291_p0 = por %p290_p13, %p289_p12 }
  0x1f   :  { %p292_p1 = pnand %p291_p0, %p285_p11 }
  0x21   :  { %295 = shalt.err (!%p292_p1)
}
  0x22   :  { %s328_s0 = smov 64   ;;  %s329_s9 = smov 4  }
  0x23   :  { %34 = dma.hbm_to_vmem [thread:$0]  %s399_s1, 1024, %s29_s27, [#allocation6], %s328_s0, %s328_s0, %s329_s9  }
  0x24   :  { %318 = dma.done.wait [#allocation3], 256  }
  0x25   :  { %319 = vsyncadd [#allocation3], 4294967040 }
  0x26   :  { %320 = dma.done.wait [#allocation6], 1024  }
  0x27   :  { %321 = vsyncadd [#allocation6], 4294966272  ;;  %v330_v0 = vmov 0.0   ;;  %vm331_vm0 = vmmov 0   ;;  %v240_v1 = vld [vmem:[#allocation5] sm:$0xff]   ;;  %v241_v2 = vld [vmem:[#allocation5 + $0x8] sm:$0xff]  }
  0x28   :  { %211 = vmatprep.subr.bf16.mxu0 %v330_v0  ;;  %227 = vmatprep.mubr.msk.bf16.mxu0 %vm331_vm0, %v330_v0  ;;  %v242_v3 = vld [vmem:[#allocation5 + $0x10] sm:$0xff]   ;;  %v243_v6 = vld [vmem:[#allocation5 + $0x18] sm:$0xff]   ;;  %v244_v9 = vld [vmem:[#allocation5 + $0x20] sm:$0xff]   ;;  %s332_s13 = smov [#allocation7]  }
  0x29   :  { %212 = vmatpush3.bf16.msra.mxu0 %v240_v1  ;;  %v44_v4 = vld [vmem:[#allocation2] sm:$0xff]  ;;  %v45_v7 = vld [vmem:[#allocation2 + $0x8] sm:$0xff]  ;;  %v245_v10 = vld [vmem:[#allocation5 + $0x28] sm:$0xff]   ;;  %s180_s14 = sshll.u32 %s332_s13, 4  ;;  %s181_s14 = int_to_ptr.vmem [resolvable:$true] %s180_s14 }
  0x2a   :  { %213 = vmatprep.subr.bf16.mxu0 %v330_v0  ;;  %v46_v5 = vmul.f32 %v44_v4, %v44_v4  ;;  %v47_v8 = vmul.f32 %v45_v7, %v45_v7  ;;  %v246_v11 = vld [vmem:[#allocation5 + $0x30] sm:$0xff]   ;;  %v247_v12 = vld [vmem:[#allocation5 + $0x38] sm:$0xff]   ;;  %v56_v13 = vpack.c.bf16 %v45_v7, %v44_v4  ;;  %s296_s15 = scalar_lea.vmem %s181_s14, 256  ;;  %p301_p3 = scmp.lt.s32.totalorder %s181_s14, %s181_s14 }
  0x2b   :  { %v201_v21 = vld [vmem:[%s400_s2] ss:$0 sm:$0xff]  ;;  %p297_p2 = scmp.ne.s32.totalorder %s181_s14, %s296_s15  ;;  %p302_p4 = scmp.lt.s32.totalorder %s296_s15, %s296_s15 }
  0x2c   :  { %48 = vadd.xlane.f32.xlu0 %v46_v5 }
  0x2d   :  { %214 = vmatpush3.bf16.msra.mxu0 %v241_v2  ;;  %p303_p5 = por %p302_p4, %p301_p3 }
  0x2e   :  { %215 = vmatprep.subr.bf16.mxu0 %v330_v0 }
  0x2f   :  { %p304_p6 = pnand %p303_p5, %p297_p2 }
  0x30   :  { %50 = vadd.xlane.f32.xlu0 %v47_v8 }
  0x31   :  { %216 = vmatpush3.bf16.msra.mxu0 %v242_v3 }
  0x32   :  { %217 = vmatprep.subr.bf16.mxu0 %v330_v0 }
  0x35   :  { %218 = vmatpush3.bf16.msra.mxu0 %v243_v6 }
  0x36   :  { %219 = vmatprep.subr.bf16.mxu0 %v330_v0 }
  0x39   :  { %220 = vmatpush3.bf16.msra.mxu0 %v244_v9 }
  0x3a   :  { %221 = vmatprep.subr.bf16.mxu0 %v330_v0 }
  0x3d   :  { %222 = vmatpush3.bf16.msra.mxu0 %v245_v10 }
  0x3e   :  { %223 = vmatprep.subr.bf16.mxu0 %v330_v0 }
  0x41   :  { %224 = vmatpush3.bf16.msra.mxu0 %v246_v11 }
  0x42   :  { %225 = vmatprep.subr.bf16.mxu0 %v330_v0 }
  0x45   :  { %226 = vmatpush3.bf16.msra.mxu0 %v247_v12 }
  0x48   :  { %228 = vmatmul.mubr.bf16.vlgmr.msra.gmra.mrb[0].mxu0 %v56_v13 }
  0xb9   :  { %v49_v14 = vpop.xlane.xlu0 %48 }
  0xba   :  { %v52_v16 = vmax.f32 %v49_v14, 1e-24 }
  0xbc   :  { %248 = vrsqrt.f32 %v52_v16 }
  0xbd   :  { %v51_v15 = vpop.xlane.xlu0 %50 }
  0xbe   :  { %v53_v17 = vmax.f32 %v51_v15, 1e-24 }
  0xc0   :  { %250 = vrsqrt.f32 %v53_v17 }
  0xc6   :  { %v249_v18 = vpop.eup %248 }
  0xca   :  { %v251_v19 = vpop.eup %250 }
 0x11b   :  { %v155_v20 = vpop.f32.mrb[0].mxu0 }
 0x11c   :  { %v162_v22 = vmul.f32 %v249_v18, %v155_v20  ;;  %v229_v23 = vpop.f32.mrb[1].mxu0 }
 0x11d   :  { %v158_v24 = vpop.f32.mrb[2].mxu0 }
 0x11e   :  { %v171_v25 = vadd.f32 %v201_v21, %v162_v22  ;;  %v163_v26 = vmul.f32 %v251_v19, %v158_v24  ;;  %v230_v27 = vpop.f32.mrb[3].mxu0 }
 0x120   :  { %173 = vst [vmem:[#allocation7] sm:$0xff] %v171_v25  ;;  %v172_v28 = vadd.f32 %v201_v21, %v163_v26 }
 0x122   :  { %174 = vst [vmem:[#allocation7 + $0x8] sm:$0xff] %v172_v28 }
 0x123   :  { %307 = shalt.err (!%p304_p6)
}
 0x124   :  { %s308_s17 = scalar_lea.hbm %s401_s3, 256 }
 0x125   :  { %p309_p7 = scmp.ne.s32.totalorder %s401_s3, %s308_s17  ;;  %p312_p8 = scmp.lt.u32.totalorder %s308_s17, %s401_s3 }
 0x127   :  { %p314_p9 = pnand %p312_p8, %p309_p7 }
 0x129   :  { %317 = shalt.err (!%p314_p9)
}
 0x12a   :  { %186 = dma.vmem_to_hbm [thread:$0]  %s181_s14, 256, %s401_s3, [#allocation4], %s325_s22, %s325_s22, %s326_s23  }
 0x12b   :  { %322 = dma.done.wait [#allocation4], 256  }
 0x12c   :  { %323 = vsyncadd [#allocation4], 4294967040 }
 0x12d   :  { %190 = vsyncpa [#allocation3], 1 }
 0x12e   :  { %191 = vsyncpa [#allocation6], 1 }
 0x12f   :  { %192 = vsyncpa [#allocation4], 1 }

</bundles_post_ra>
